<compile_context>
chip_gen: v7x
topology: tpu7x:2x2x1
jax: 0.10.0
libtpu: 0.0.40
codegen_flags: <defaults>
</compile_context>

<pallas_src>
import jax
import jax.numpy as jnp
from jax.experimental import pallas as pl
from jax.experimental.pallas import tpu as pltpu


def _linear_kernel(x_ref, w_ref, b_ref, o_ref):
    """x_ref: (TB, F) VMEM, w_ref: (O, F) VMEM, b_ref: (O,) SMEM, o_ref: (TB, O) VMEM."""
    # Contract x's last dim with w's last dim: (TB, F) x (O, F) -> (TB, O).
    # No transpose / vreg relayout anywhere; the MXU takes the (O, F) operand as
    # the "transposed" side directly. Accumulate in f32.
    out = jax.lax.dot_general(
        x_ref[...],
        w_ref[...],
        dimension_numbers=(((1,), (1,)), ((), ())),
        preferred_element_type=jnp.float32,
    )

    # Bias arrives as O (=2) scalars in SMEM; build a (1, O) row via scalar
    # selects (O is a tiny static int, loop is unrolled at trace time) and let
    # it broadcast over the batch rows. Avoids an extra padded VMEM input DMA.
    out_dim = o_ref.shape[-1]
    col = jax.lax.broadcasted_iota(jnp.int32, (1, out_dim), 1)
    bias_row = jnp.zeros((1, out_dim), jnp.float32)
    for j in range(out_dim):  # unrolled: out_dim is small & static
        bias_row = jnp.where(col == j, b_ref[j], bias_row)

    o_ref[...] = (out + bias_row).astype(o_ref.dtype)


def insurance_model_forward(xb, weight, bias, *, block_b=512, use_bf16_inputs=False):
    """Linear forward: xb (B, F) f32, weight (O, F) f32, bias (O,) f32 -> (B, O) f32."""
    B, F = xb.shape
    O, F_w = weight.shape
    assert F == F_w, (F, F_w)

    x = xb
    w = weight
    if use_bf16_inputs:
        # v6e/v7x: halves HBM traffic on the dominant (x) stream; accumulation
        # stays f32 via preferred_element_type in the kernel.
        x = x.astype(jnp.bfloat16)
        w = w.astype(jnp.bfloat16)
    b = bias.astype(jnp.float32)

    if B <= block_b:
        # Small batch: one kernel invocation, no grid, full-array blocks in VMEM,
        # bias scalars in SMEM.
        return pl.pallas_call(
            _linear_kernel,
            out_shape=jax.ShapeDtypeStruct((B, O), jnp.float32),
            in_specs=[
                pl.BlockSpec(memory_space=pltpu.VMEM),   # x     (B, F)
                pl.BlockSpec(memory_space=pltpu.VMEM),   # W     (O, F)
                pl.BlockSpec(memory_space=pltpu.SMEM),   # bias  (O,) scalars
            ],
            out_specs=pl.BlockSpec(memory_space=pltpu.VMEM),
        )(x, w, b)

    # Large batch: tile ONLY the batch axis; weight/bias stay resident across the
    # grid. The op is HBM-bandwidth bound (~80 FLOPs per 88 B/row), so the only
    # lever is streaming x with big row tiles and DMA/compute overlap. The batch
    # axis is "parallel" so v7x's two TensorCores split disjoint row ranges.
    # TODO(synk): on v7x consider pipeline_mode=pl.Buffered(3) on the x spec
    # (fits easily inside the 64 MiB VMEM budget with F=20) to deepen DMA overlap.
    nb = pl.cdiv(B, block_b)
    b_pad = nb * block_b
    if b_pad != B:
        x = jnp.pad(x, ((0, b_pad - B), (0, 0)))

    out = pl.pallas_call(
        _linear_kernel,
        out_shape=jax.ShapeDtypeStruct((b_pad, O), jnp.float32),
        grid=(nb,),
        in_specs=[
            pl.BlockSpec((block_b, F), lambda i: (i, 0)),   # x rows, streamed
            pl.BlockSpec((O, F), lambda i: (0, 0)),         # weight, VMEM-resident
            pl.BlockSpec(memory_space=pltpu.SMEM),          # bias, SMEM-resident
        ],
        out_specs=pl.BlockSpec((block_b, O), lambda i: (i, 0)),
        compiler_params=pltpu.CompilerParams(
            dimension_semantics=("parallel",),
        ),
    )(x, w, b)
    return out[:B]


if __name__ == "__main__":
    # Bank-marketing style feature vector -> 2 logits.
    batch_size = 32
    input_size = 20     # number of feature columns (input_cols)
    output_size = 2

    key = jax.random.PRNGKey(0)
    kx, kw, kb, kx2 = jax.random.split(key, 4)

    xb = jax.random.normal(kx, (batch_size, input_size), dtype=jnp.float32)

    # Deterministic parameter init (mimicking nn.Linear's uniform scheme).
    bound = 1.0 / (input_size ** 0.5)
    weight = jax.random.uniform(
        kw, (output_size, input_size), minval=-bound, maxval=bound,
        dtype=jnp.float32)
    bias = jax.random.uniform(
        kb, (output_size,), minval=-bound, maxval=bound, dtype=jnp.float32)

    # 1) Small-batch path (gridless, full-array VMEM blocks, SMEM bias).
    out = jax.block_until_ready(insurance_model_forward(xb, weight, bias))
    ref = xb @ weight.T + bias
    assert out.shape == (batch_size, output_size)
    assert jnp.allclose(out, ref, atol=1e-5, rtol=1e-5)

    # 2) Batch-tiled path (grid over rows, weight/bias resident, "parallel" axis),
    #    including the non-divisible-batch padding/slice handling.
    big_b = 1000
    xb_big = jax.random.normal(kx2, (big_b, input_size), dtype=jnp.float32)
    out_big = jax.block_until_ready(
        insurance_model_forward(xb_big, weight, bias, block_b=512))
    ref_big = xb_big @ weight.T + bias
    assert out_big.shape == (big_b, output_size)
    assert jnp.allclose(out_big, ref_big, atol=1e-5, rtol=1e-5)

    print("KERNEL_OK")
</pallas_src>

<mosaic_0001>
module attributes {stable_mosaic.version = 11 : i64} {
  func.func @_linear_kernel(%arg0: memref<32x20xf32, #tpu.memory_space<vmem>>, %arg1: memref<2x20xf32, #tpu.memory_space<vmem>>, %arg2: memref<2xf32, #tpu.memory_space<smem>>, %arg3: memref<32x2xf32, #tpu.memory_space<vmem>>) attributes {dimension_semantics = [], scalar_prefetch = 0 : i64, scratch_operands = 0 : i64, tpu.core_type = #tpu.core_type<tc>} {
    %c0 = arith.constant 0 : index
    %c0_0 = arith.constant 0 : index
    %0 = vector.load %arg0[%c0, %c0_0] : memref<32x20xf32, #tpu.memory_space<vmem>>, vector<32x20xf32>
    %c0_1 = arith.constant 0 : index
    %c0_2 = arith.constant 0 : index
    %1 = vector.load %arg1[%c0_1, %c0_2] : memref<2x20xf32, #tpu.memory_space<vmem>>, vector<2x20xf32>
    %cst = arith.constant dense<0.000000e+00> : vector<32x2xf32>
    %2 = tpu.matmul %0, %1, %cst {dimension_numbers = #tpu.dot_dimension_numbers<[1], [1], [0], [0], [0, 0, 1, 0], [], []>} : vector<32x20xf32>, vector<2x20xf32>, vector<32x2xf32> -> vector<32x2xf32>
    %3 = tpu.iota {dimensions = array<i32: 1>} : vector<1x2xi32>
    %cst_3 = arith.constant 0.000000e+00 : f32
    %4 = vector.broadcast %cst_3 : f32 to vector<1x2xf32>
    %c0_i32 = arith.constant 0 : i32
    %5 = vector.broadcast %c0_i32 : i32 to vector<1x2xi32>
    %6 = arith.cmpi eq, %3, %5 : vector<1x2xi32>
    %c0_4 = arith.constant 0 : index
    %7 = memref.load %arg2[%c0_4] : memref<2xf32, #tpu.memory_space<smem>>
    %8 = vector.broadcast %7 : f32 to vector<1x2xf32>
    %9 = arith.select %6, %8, %4 : vector<1x2xi1>, vector<1x2xf32>
    %c1_i32 = arith.constant 1 : i32
    %10 = vector.broadcast %c1_i32 : i32 to vector<1x2xi32>
    %11 = arith.cmpi eq, %3, %10 : vector<1x2xi32>
    %c1 = arith.constant 1 : index
    %12 = memref.load %arg2[%c1] : memref<2xf32, #tpu.memory_space<smem>>
    %13 = vector.broadcast %12 : f32 to vector<1x2xf32>
    %14 = arith.select %11, %13, %9 : vector<1x2xi1>, vector<1x2xf32>
    %15 = vector.broadcast %14 : vector<1x2xf32> to vector<32x2xf32>
    %16 = arith.addf %2, %15 : vector<32x2xf32>
    %c0_5 = arith.constant 0 : index
    %c0_6 = arith.constant 0 : index
    %17 = vector.load %arg3[%c0_5, %c0_6] : memref<32x2xf32, #tpu.memory_space<vmem>>, vector<32x2xf32>
    tpu.vector_store %arg3[%c0_5, %c0_6], %16 {strides = array<i32>} : memref<32x2xf32, #tpu.memory_space<vmem>>, vector<32x2xf32>,
    return
  }
}

</mosaic_0001>

<bundles_post_ra>
// kernel: tpu_custom_call.1
= control target key start
LH: loop header
LB: loop body
LE: loop exit
PB: predicated region body
PF: predicated region fallthrough
CT: control target
= control target key end

     0   :  { %8 = vsyncpa [#allocation3], 0  ;;  %s240_s0 = inlined_call_operand.vmem [shape: f32[32,20], index: 0, kind: input, shape index: {}]   ;;  %s241_s1 = inlined_call_operand.vmem [shape: f32[2,20], index: 1, kind: input, shape index: {}]   ;;  %s242_s2 = inlined_call_operand.vmem [shape: f32[2], index: 2, kind: input, shape index: {}]   ;;  %s243_s3 = inlined_call_operand.vmem [shape: f32[32,2], index: 3, kind: output, shape index: {}]  }
   0x1   :  { %s19_s14 = sshll.u32 %s242_s2, 4  ;;  %s20_s14 = int_to_ptr.vmem [resolvable:$true] %s19_s14 }
   0x2   :  { %s175_s15 = scalar_lea.vmem %s20_s14, 16  ;;  %p180_p1 = scmp.lt.s32.totalorder %s20_s14, %s20_s14 }
   0x3   :  { %p176_p0 = scmp.ne.s32.totalorder %s20_s14, %s175_s15  ;;  %p181_p2 = scmp.lt.s32.totalorder %s175_s15, %s175_s15 }
   0x5   :  { %p182_p3 = por %p181_p2, %p180_p1 }
   0x7   :  { %p183_p4 = pnand %p182_p3, %p176_p0 }
   0x9   :  { %186 = shalt.err (!%p183_p4)
}
   0xa   :  { %s189_s16 = smov [#allocation2]  }
   0xb   :  { %22 = dma.vmem_to_smem %s20_s14, 16, %s189_s16, [#allocation3]  }
   0xc   :  { %187 = dma.done.wait [#allocation3], 16  }
   0xd   :  { %188 = vsyncadd [#allocation3], 4294967280 }
   0xe   :  { %26 = sfence }
   0xf   :  { %v31_v0 = vld [vmem:[%s241_s1] sm:$0x3]  ;;  %vm42_vm0 = vcmask 162816   ;;  %v29_v2 = vld [vmem:[%s240_s0 + $0x10] sm:$0xff]  ;;  %v28_v3 = vld [vmem:[%s240_s0 + $0x8] sm:$0xff]  ;;  %v32_v5 = vlaneseq  ;;  %s35_s1 = sld [smem:[#allocation2]] }
  0x10   :  { %v27_v1 = vld [vmem:[%s240_s0] sm:$0xff]  ;;  %164 = vmatprep.subr.msk.mxu0 %vm42_vm0, %v31_v0  ;;  %172 = vmatprep.subr.msk.mxu1 %vm42_vm0, %v31_v0  ;;  %v30_v4 = vld [vmem:[%s240_s0 + $0x18] sm:$0xff]  ;;  %s153_s26 = sld [smem:[#allocation2 + $0x1]]  ;;  %vm143_vm3 = vcmask 15360  }
  0x11   :  { %165 = vmatpush3.xpose.msk.msra.mxu0 %vm42_vm0, %v31_v0  ;;  %173 = vmatpush3.xpose.msk.msra.mxu1 %vm42_vm0, %v31_v0  ;;  %v33_v6 = vand.u32 127, %v32_v5 }
  0x12   :  { %166 = vmatprep.mubr.msk.f32.mxu0 %vm42_vm0, %v27_v1  ;;  %169 = vmatprep.mubr.msk.f32.mxu1 %vm42_vm0, %v29_v2 }
  0x13   :  { %vm34_vm1 = vcmp.eq.s32.totalorder %v33_v6, 0  ;;  %vm38_vm2 = vcmp.eq.s32.totalorder %v33_v6, 1 }
  0x14   :  { %167 = vmatmul.mubr.msk.f32.vlgmr.msra.gmra.mrb[0].mxu0 %vm42_vm0, %v28_v3  ;;  %170 = vmatmul.mubr.msk.f32.vlgmr.msra.gmra.mrb[0].mxu1 %vm42_vm0, %v30_v4 }
  0x15   :  { %v36_v7 = vstv %s35_s1 }
  0x16   :  { %v37_v8 = vsel %vm34_vm1, %v36_v7, 0.0  ;;  %v40_v9 = vstv %s153_s26 }
  0x17   :  { %v41_v10 = vsel %vm38_vm2, %v40_v9, %v37_v8 }
  0xe7   :  { %v168_v11 = vpop.f32.mrb[0].mxu0  ;;  %v171_v12 = vpop.f32.mrb[0].mxu1 }
  0xe8   :  { %v130_v13 = vadd.f32 %v168_v11, %v41_v10  ;;  %v140_v14 = vadd.f32 %v171_v12, %v41_v10  ;;  %v124_v15 = vpop.f32.mrb[1].mxu0  ;;  %v134_v16 = vpop.f32.mrb[1].mxu1 }
  0xe9   :  { %v125_v17 = vadd.f32 %v124_v15, %v41_v10  ;;  %v135_v18 = vadd.f32 %v134_v16, %v41_v10 }
  0xea   :  { %145 = vst.msk [vmem:[%s243_s3 + $0x8] sm:$0xff] %vm143_vm3, %v130_v13  ;;  %147 = vst.msk [vmem:[%s243_s3 + $0x18] sm:$0xff] %vm143_vm3, %v140_v14 }
  0xeb   :  { %144 = vst.msk [vmem:[%s243_s3] sm:$0xff] %vm143_vm3, %v125_v17  ;;  %146 = vst.msk [vmem:[%s243_s3 + $0x10] sm:$0xff] %vm143_vm3, %v135_v18 }
  0xec   :  { %152 = vsyncpa [#allocation3], 1 }

</bundles_post_ra>
